<compile_context>
chip_gen: v5e
topology: v5e:2x2
jax: 0.10.0
libtpu: 0.0.40
codegen_flags: <defaults>
</compile_context>

<pallas_src>
import math

import jax
import jax.numpy as jnp
from jax.experimental import pallas as pl
from jax.experimental.pallas import tpu as pltpu

_LANES = 128
# ~1 MiB per block: measured sweet spot (0.5-2 MiB) for mem-bound copies.
_TARGET_BLOCK_BYTES = 1 << 20


def _copy_kernel(x_ref, o_ref):
    # Identity copy of one (block_rows, 128) block: the entire forward of View.
    o_ref[...] = x_ref[...]


def _sublane_multiple(dtype):
    # Native packed-tile sublane count: f32 -> 8, bf16/fp16 -> 16, int8/fp8 -> 32.
    return max(8, 32 // jnp.dtype(dtype).itemsize)


def _copy_2d(x2d):
    """Identity copy of a (rows, 128) array using large HBM-bound blocks."""
    rows, lanes = x2d.shape
    dtype = x2d.dtype
    itemsize = jnp.dtype(dtype).itemsize
    sub = _sublane_multiple(dtype)

    # Largest block <= ~1 MiB, rounded down to the packed-sublane tile.
    max_rows = max(sub, (_TARGET_BLOCK_BYTES // (lanes * itemsize)) // sub * sub)
    if rows <= max_rows:
        # Single block equal to the full array extent: always a legal block
        # shape, grid=(1,), no partial/masked stores.
        block_rows = rows
    else:
        # Multiple of the packed-sublane tile; a ragged last block (if any) is
        # handled by Pallas' out-of-bounds masking.
        block_rows = max_rows

    grid = (pl.cdiv(rows, block_rows),)
    return pl.pallas_call(
        _copy_kernel,
        out_shape=jax.ShapeDtypeStruct((rows, lanes), dtype),
        grid=grid,
        in_specs=[pl.BlockSpec((block_rows, lanes), lambda i: (i, 0))],
        out_specs=pl.BlockSpec((block_rows, lanes), lambda i: (i, 0)),
        compiler_params=pltpu.CompilerParams(
            dimension_semantics=("parallel",),
        ),
        cost_estimate=pl.CostEstimate(
            flops=0,
            transcendentals=0,
            bytes_accessed=2 * rows * lanes * itemsize,
        ),
    )(x2d)


def _resolve_shape(numel, shape):
    """Resolve a torch.view-style shape (may contain a single -1)."""
    shape = list(shape)
    if shape.count(-1) > 1:
        raise ValueError("only one dimension can be -1")
    if -1 in shape:
        known = math.prod(d for d in shape if d != -1)
        if known == 0 or numel % known != 0:
            raise ValueError(f"cannot view {numel} elements as {shape}")
        shape[shape.index(-1)] = numel // known
    if math.prod(shape) != numel:
        raise ValueError(f"cannot view {numel} elements as {shape}")
    return tuple(shape)


def view(x, *shape):
    """Pallas equivalent of View(*shape).forward(x)."""
    numel = x.size
    out_shape = _resolve_shape(numel, shape)

    if numel == 0:
        # A zero-size grid would not lower; the reshape is metadata-only anyway.
        return jnp.reshape(x, out_shape)

    flat = jnp.reshape(x, (numel,))  # metadata-only for row-major layouts

    if numel % _LANES == 0:
        # Fast path: no padding, no extra HBM passes.
        out2d = _copy_2d(jnp.reshape(flat, (numel // _LANES, _LANES)))
        return jnp.reshape(out2d, out_shape)

    # Rare lane-ragged fallback: pad by <=127 elements to the next lane
    # multiple, copy, slice.  This costs one extra HBM pass, but only triggers
    # when numel is not a multiple of 128.
    padded = -(-numel // _LANES) * _LANES
    flat = jnp.pad(flat, (0, padded - numel))
    out2d = _copy_2d(jnp.reshape(flat, (padded // _LANES, _LANES)))
    return jnp.reshape(jnp.reshape(out2d, (padded,))[:numel], out_shape)


if __name__ == "__main__":
    key = jax.random.PRNGKey(0)

    # View(2, -1) applied to x of shape (2, 4, 16, 16) -> (2, 1024).
    x = jax.random.normal(key, (2, 4, 16, 16), dtype=jnp.float32)
    out = jax.block_until_ready(view(x, 2, -1))
    ref = jnp.reshape(x, (2, -1))
    assert out.shape == (2, 1024), out.shape
    assert out.dtype == x.dtype
    assert bool(jnp.array_equal(out, ref))

    # bf16 input exercising the dtype-aware (16,128)-aligned block sizing.
    xb = jax.random.normal(jax.random.PRNGKey(0), (2, 8, 128), dtype=jnp.bfloat16)
    outb = jax.block_until_ready(view(xb, 4, -1))
    assert outb.shape == (4, 512), outb.shape
    assert outb.dtype == xb.dtype
    assert bool(jnp.array_equal(outb, jnp.reshape(xb, (4, -1))))

    print("KERNEL_OK")
</pallas_src>

<mosaic_0001>
module attributes {stable_mosaic.version = 11 : i64} {
  func.func @_copy_kernel(%arg0: i32, %arg1: memref<16x128xf32, #tpu.memory_space<vmem>>, %arg2: memref<16x128xf32, #tpu.memory_space<vmem>>) attributes {dimension_semantics = [#tpu.dimension_semantics<parallel>], iteration_bounds = array<i64: 1>, scalar_prefetch = 0 : i64, scratch_operands = 0 : i64, tpu.core_type = #tpu.core_type<tc>, window_params = [{transform_indices = @transform_0, window_bounds = array<i64: 16, 128>}, {transform_indices = @transform_1, window_bounds = array<i64: 16, 128>}]} {
    %c0 = arith.constant 0 : index
    %c0_0 = arith.constant 0 : index
    %0 = vector.load %arg1[%c0, %c0_0] : memref<16x128xf32, #tpu.memory_space<vmem>>, vector<16x128xf32>
    %c0_1 = arith.constant 0 : index
    %c0_2 = arith.constant 0 : index
    %1 = vector.load %arg2[%c0_1, %c0_2] : memref<16x128xf32, #tpu.memory_space<vmem>>, vector<16x128xf32>
    tpu.vector_store %arg2[%c0_1, %c0_2], %0 {strides = array<i32>} : memref<16x128xf32, #tpu.memory_space<vmem>>, vector<16x128xf32>,
    return
  }
  func.func @transform_0(%arg0: i32) -> (i32, i32) {
    %c0_i32 = arith.constant 0 : i32
    %c0_i32_0 = arith.constant 0 : i32
    return %arg0, %c0_i32 : i32, i32
  }
  func.func @transform_1(%arg0: i32) -> (i32, i32) {
    %c0_i32 = arith.constant 0 : i32
    %c0_i32_0 = arith.constant 0 : i32
    return %arg0, %c0_i32 : i32, i32
  }
}

</mosaic_0001>

<bundles_post_ra>
// kernel: tpu_custom_call.1
= control target key start
LH: loop header
LB: loop body
LE: loop exit
PB: predicated region body
PF: predicated region fallthrough
CT: control target
= control target key end

     0   :  { %6 = vsyncpa [#allocation3], 0  ;;  %s124_s0 = inlined_call_operand.hbm [shape: f32[16,128], index: 0, kind: input, shape index: {}]   ;;  %s125_s1 = inlined_call_operand.hbm [shape: f32[16,128], index: 1, kind: output, shape index: {}]  }
   0x1   :  { %7 = vsyncpa [#allocation4], 0  ;;  %s12_s8 = sshll.u32 %s124_s0, 4  ;;  %s104_s9 = smov [#allocation2]   ;;  %s13_s8 = int_to_ptr.hbm [resolvable:$true] %s12_s8 }
   0x2   :  { %s14_s10 = sshll.u32 %s104_s9, 4  ;;  %s105_s11 = smov 128   ;;  %s15_s10 = int_to_ptr.vmem [resolvable:$true] %s14_s10 }
   0x3   :  { %s106_s12 = smov 8  }
   0x4   :  { %20 = dma.hbm_to_vmem [thread:$0]  %s13_s8, 256, %s15_s10, [#allocation3], %s105_s11, %s105_s11, %s106_s12  }
   0x5   :  { %100 = dma.done.wait [#allocation3], 256  }
   0x6   :  { %101 = vsyncadd [#allocation3], 4294967040  ;;  %s107_s13 = smov [#allocation5]   ;;  %s35_s17 = sshll.u32 %s125_s1, 4  ;;  %v25_v0 = vld [vmem:[#allocation2] sm:$0xff]  ;;  %v26_v1 = vld [vmem:[#allocation2 + $0x8] sm:$0xff]  ;;  %s36_s17 = int_to_ptr.hbm [resolvable:$true] %s35_s17 }
   0x7   :  { %s33_s14 = sshll.u32 %s107_s13, 4  ;;  %27 = vst [vmem:[#allocation5] sm:$0xff] %v25_v0  ;;  %s34_s14 = int_to_ptr.vmem [resolvable:$true] %s33_s14 }
   0x8   :  { %28 = vst [vmem:[#allocation5 + $0x8] sm:$0xff] %v26_v1 }
   0x9   :  { %41 = dma.vmem_to_hbm [thread:$0]  %s34_s14, 256, %s36_s17, [#allocation4], %s105_s11, %s105_s11, %s106_s12  }
   0xa   :  { %102 = dma.done.wait [#allocation4], 256  }
   0xb   :  { %103 = vsyncadd [#allocation4], 4294967040 }
   0xc   :  { %46 = vsyncpa [#allocation3], 1 }
   0xd   :  { %47 = vsyncpa [#allocation4], 1 }

</bundles_post_ra>
